<compile_context>
chip_gen: v7x
topology: tpu7x:2x2x1
jax: 0.10.0
libtpu: 0.0.40
codegen_flags: <defaults>
</compile_context>

<pallas_src>
import jax
import jax.numpy as jnp
from jax.experimental import pallas as pl
from jax.experimental.pallas import tpu as pltpu

IN_F = 784      # input features (28*28); equals full array dim, so lane-legal as-is
H_PAD = 256     # hidden width 200 padded to 256 (2x128 lanes)
OUT_PAD = 128   # output width 10 padded to 128 (1x128 lanes)
OUT_F = 10
TM_CAP = 1024   # max batch-tile rows (double-buffered f32 x tile ~6.4 MiB at 1024)


def _round_up(x, m):
    return (x + m - 1) // m * m


def _mlp_kernel(x_ref, w1_ref, b1_ref, w2_ref, b2_ref, w3_ref, b3_ref, o_ref):
    # f32 activations arrive from HBM; cast to bf16 on the VPU for the MXU.
    x = x_ref[...].astype(jnp.bfloat16)                       # (TM, 784) bf16

    # Layer 1: bf16 MXU matmul, f32 accumulate, implicit (1,H) bias broadcast, ReLU.
    h1 = jnp.dot(x, w1_ref[...], preferred_element_type=jnp.float32) + b1_ref[...]
    h1 = jnp.maximum(h1, 0.0)

    # Layer 2.
    h2 = jnp.dot(h1.astype(jnp.bfloat16), w2_ref[...],
                 preferred_element_type=jnp.float32) + b2_ref[...]
    h2 = jnp.maximum(h2, 0.0)

    # Layer 3 (no activation); lane-dense (TM, 128) bf16 store.
    out = jnp.dot(h2.astype(jnp.bfloat16), w3_ref[...],
                  preferred_element_type=jnp.float32) + b3_ref[...]
    o_ref[...] = out.astype(o_ref.dtype)


def prepare_params(w1, b1, w2, b2, w3, b3):
    """Pad feature dims to lane-dense widths and cast weights to bf16 (once)."""
    w1p = jnp.zeros((IN_F, H_PAD), jnp.bfloat16).at[:, :200].set(w1.astype(jnp.bfloat16))
    b1p = jnp.zeros((1, H_PAD), jnp.float32).at[:, :200].set(b1.astype(jnp.float32))
    w2p = jnp.zeros((H_PAD, H_PAD), jnp.bfloat16).at[:200, :200].set(w2.astype(jnp.bfloat16))
    b2p = jnp.zeros((1, H_PAD), jnp.float32).at[:, :200].set(b2.astype(jnp.float32))
    w3p = jnp.zeros((H_PAD, OUT_PAD), jnp.bfloat16).at[:200, :OUT_F].set(w3.astype(jnp.bfloat16))
    b3p = jnp.zeros((1, OUT_PAD), jnp.float32).at[:, :OUT_F].set(b3.astype(jnp.float32))
    return w1p, b1p, w2p, b2p, w3p, b3p


@jax.jit
def feedforward_nn(x, w1p, b1p, w2p, b2p, w3p, b3p):
    # Equivalent of x.view(-1, 784). Reshape is a view; x stays f32 (cast in-kernel).
    x2d = x.reshape(-1, IN_F)
    batch = x2d.shape[0]

    # Batch tile: large enough to hide per-step overhead, small enough to keep
    # >= ~4 grid steps for large batches (v7x dual TensorCore sharding) and to
    # stay well inside scoped VMEM (footprint ~12 MiB at TM=1024).
    tm = min(TM_CAP, _round_up(max(pl.cdiv(batch, 4), 1), 8))
    grid = (pl.cdiv(batch, tm),)   # ragged last tile handled by Pallas (no jnp.pad)

    out_padded = pl.pallas_call(
        _mlp_kernel,
        out_shape=jax.ShapeDtypeStruct((batch, OUT_PAD), jnp.bfloat16),
        grid=grid,
        in_specs=[
            pl.BlockSpec((tm, IN_F), lambda i: (i, 0)),       # x tile, streamed (f32)
            pl.BlockSpec((IN_F, H_PAD), lambda i: (0, 0)),    # resident weights / biases
            pl.BlockSpec((1, H_PAD), lambda i: (0, 0)),
            pl.BlockSpec((H_PAD, H_PAD), lambda i: (0, 0)),
            pl.BlockSpec((1, H_PAD), lambda i: (0, 0)),
            pl.BlockSpec((H_PAD, OUT_PAD), lambda i: (0, 0)),
            pl.BlockSpec((1, OUT_PAD), lambda i: (0, 0)),
        ],
        out_specs=pl.BlockSpec((tm, OUT_PAD), lambda i: (i, 0)),
        compiler_params=pltpu.CompilerParams(
            dimension_semantics=("parallel",),
            vmem_limit_bytes=32 * 1024 * 1024,   # covers v5e's 16 MiB scoped default
        ),
    )(x2d, w1p, b1p, w2p, b2p, w3p, b3p)

    # Drop the lane padding of the 10-wide output; return f32 logits (tiny op).
    return out_padded[:, :OUT_F].astype(jnp.float32)


def init_params(key):
    """Deterministic synthetic parameters matching nn.Linear fan-in init.

    PyTorch shapes: fc1.weight (200,784), fc2.weight (200,200), fc3.weight (10,200).
    Stored here in transposed (in, out) layout; biases are (1, out).
    """
    k1, k2, k3, k4, k5, k6 = jax.random.split(key, 6)

    def uni(k, shape, fan_in):
        bound = 1.0 / jnp.sqrt(jnp.float32(fan_in))
        return jax.random.uniform(k, shape, jnp.float32, -bound, bound)

    w1 = uni(k1, (784, 200), 784)
    b1 = uni(k2, (1, 200), 784)
    w2 = uni(k3, (200, 200), 200)
    b2 = uni(k4, (1, 200), 200)
    w3 = uni(k5, (200, 10), 200)
    b3 = uni(k6, (1, 10), 200)
    return w1, b1, w2, b2, w3, b3


def reference_bf16(x, w1, b1, w2, b2, w3, b3):
    """Pure-JAX reference matching the kernel's bf16-MXU / f32-accumulate math."""
    x2d = x.reshape(-1, IN_F)

    def mm(a, w):
        return jnp.dot(a.astype(jnp.bfloat16), w.astype(jnp.bfloat16),
                       preferred_element_type=jnp.float32)

    h1 = jnp.maximum(mm(x2d, w1) + b1, 0.0)
    h2 = jnp.maximum(mm(h1, w2) + b2, 0.0)
    return mm(h2, w3) + b3


def reference_f32(x, w1, b1, w2, b2, w3, b3):
    x2d = x.reshape(-1, IN_F)
    h1 = jnp.maximum(x2d @ w1 + b1, 0.0)
    h2 = jnp.maximum(h1 @ w2 + b2, 0.0)
    return h2 @ w3 + b3


if __name__ == "__main__":
    key = jax.random.PRNGKey(0)
    k_params, k_x = jax.random.split(key)

    params = init_params(k_params)
    padded_params = prepare_params(*params)

    # Small MNIST-like batch: (B, C, H, W) = (8, 1, 28, 28) -> flattened 784 features.
    x = jax.random.normal(k_x, (8, 1, 28, 28), jnp.float32)

    out = feedforward_nn(x, *padded_params)
    out = jax.block_until_ready(out)
    assert out.shape == (8, 10), out.shape
    assert bool(jnp.all(jnp.isfinite(out))), "non-finite logits"

    # Check vs a reference using identical bf16-input / f32-accumulate math
    # (kernel output is additionally bf16-rounded on store, hence the tolerance).
    ref_bf16 = reference_bf16(x, *params)
    assert jnp.allclose(out, ref_bf16, atol=1e-2, rtol=1e-2), "mismatch vs bf16 reference"

    # Loose sanity check vs the full-f32 PyTorch-equivalent forward.
    ref_f32 = reference_f32(x, *params)
    assert jnp.allclose(out, ref_f32, atol=5e-2, rtol=5e-2), "mismatch vs f32 reference"

    print("KERNEL_OK")
</pallas_src>

<mosaic_0001>
module attributes {stable_mosaic.version = 11 : i64} {
  func.func @_mlp_kernel(%arg0: i32, %arg1: memref<8x784xf32, #tpu.memory_space<vmem>>, %arg2: memref<784x256xbf16, #tpu.memory_space<vmem>>, %arg3: memref<1x256xf32, #tpu.memory_space<vmem>>, %arg4: memref<256x256xbf16, #tpu.memory_space<vmem>>, %arg5: memref<1x256xf32, #tpu.memory_space<vmem>>, %arg6: memref<256x128xbf16, #tpu.memory_space<vmem>>, %arg7: memref<1x128xf32, #tpu.memory_space<vmem>>, %arg8: memref<8x128xbf16, #tpu.memory_space<vmem>>) attributes {dimension_semantics = [#tpu.dimension_semantics<parallel>], iteration_bounds = array<i64: 1>, scalar_prefetch = 0 : i64, scratch_operands = 0 : i64, tpu.core_type = #tpu.core_type<tc>, window_params = [{transform_indices = @transform_0, window_bounds = array<i64: 8, 784>}, {pipeline_mode = #tpu.pipeline_mode<synchronous>, transform_indices = @transform_1, window_bounds = array<i64: 784, 256>}, {pipeline_mode = #tpu.pipeline_mode<synchronous>, transform_indices = @transform_2, window_bounds = array<i64: 1, 256>}, {pipeline_mode = #tpu.pipeline_mode<synchronous>, transform_indices = @transform_3, window_bounds = array<i64: 256, 256>}, {pipeline_mode = #tpu.pipeline_mode<synchronous>, transform_indices = @transform_4, window_bounds = array<i64: 1, 256>}, {pipeline_mode = #tpu.pipeline_mode<synchronous>, transform_indices = @transform_5, window_bounds = array<i64: 256, 128>}, {pipeline_mode = #tpu.pipeline_mode<synchronous>, transform_indices = @transform_6, window_bounds = array<i64: 1, 128>}, {transform_indices = @transform_7, window_bounds = array<i64: 8, 128>}]} {
    %c0 = arith.constant 0 : index
    %c0_0 = arith.constant 0 : index
    %0 = vector.load %arg1[%c0, %c0_0] : memref<8x784xf32, #tpu.memory_space<vmem>>, vector<8x784xf32>
    %1 = arith.truncf %0 : vector<8x784xf32> to vector<8x784xbf16>
    %c0_1 = arith.constant 0 : index
    %c0_2 = arith.constant 0 : index
    %2 = vector.load %arg2[%c0_1, %c0_2] : memref<784x256xbf16, #tpu.memory_space<vmem>>, vector<784x256xbf16>
    %cst = arith.constant dense<0.000000e+00> : vector<8x256xf32>
    %3 = tpu.matmul %1, %2, %cst {dimension_numbers = #tpu.dot_dimension_numbers<[1], [0], [0], [1], [0, 0, 1, 1], [], []>} : vector<8x784xbf16>, vector<784x256xbf16>, vector<8x256xf32> -> vector<8x256xf32>
    %c0_3 = arith.constant 0 : index
    %c0_4 = arith.constant 0 : index
    %4 = vector.load %arg3[%c0_3, %c0_4] : memref<1x256xf32, #tpu.memory_space<vmem>>, vector<1x256xf32>
    %5 = vector.broadcast %4 : vector<1x256xf32> to vector<8x256xf32>
    %6 = arith.addf %3, %5 : vector<8x256xf32>
    %cst_5 = arith.constant 0.000000e+00 : f32
    %7 = vector.broadcast %cst_5 : f32 to vector<8x256xf32>
    %8 = arith.maximumf %6, %7 : vector<8x256xf32>
    %9 = arith.truncf %8 : vector<8x256xf32> to vector<8x256xbf16>
    %c0_6 = arith.constant 0 : index
    %c0_7 = arith.constant 0 : index
    %10 = vector.load %arg4[%c0_6, %c0_7] : memref<256x256xbf16, #tpu.memory_space<vmem>>, vector<256x256xbf16>
    %cst_8 = arith.constant dense<0.000000e+00> : vector<8x256xf32>
    %11 = tpu.matmul %9, %10, %cst_8 {dimension_numbers = #tpu.dot_dimension_numbers<[1], [0], [0], [1], [0, 0, 1, 1], [], []>} : vector<8x256xbf16>, vector<256x256xbf16>, vector<8x256xf32> -> vector<8x256xf32>
    %c0_9 = arith.constant 0 : index
    %c0_10 = arith.constant 0 : index
    %12 = vector.load %arg5[%c0_9, %c0_10] : memref<1x256xf32, #tpu.memory_space<vmem>>, vector<1x256xf32>
    %13 = vector.broadcast %12 : vector<1x256xf32> to vector<8x256xf32>
    %14 = arith.addf %11, %13 : vector<8x256xf32>
    %cst_11 = arith.constant 0.000000e+00 : f32
    %15 = vector.broadcast %cst_11 : f32 to vector<8x256xf32>
    %16 = arith.maximumf %14, %15 : vector<8x256xf32>
    %17 = arith.truncf %16 : vector<8x256xf32> to vector<8x256xbf16>
    %c0_12 = arith.constant 0 : index
    %c0_13 = arith.constant 0 : index
    %18 = vector.load %arg6[%c0_12, %c0_13] : memref<256x128xbf16, #tpu.memory_space<vmem>>, vector<256x128xbf16>
    %cst_14 = arith.constant dense<0.000000e+00> : vector<8x128xf32>
    %19 = tpu.matmul %17, %18, %cst_14 {dimension_numbers = #tpu.dot_dimension_numbers<[1], [0], [0], [1], [0, 0, 1, 1], [], []>} : vector<8x256xbf16>, vector<256x128xbf16>, vector<8x128xf32> -> vector<8x128xf32>
    %c0_15 = arith.constant 0 : index
    %c0_16 = arith.constant 0 : index
    %20 = vector.load %arg7[%c0_15, %c0_16] : memref<1x128xf32, #tpu.memory_space<vmem>>, vector<1x128xf32>
    %21 = vector.broadcast %20 : vector<1x128xf32> to vector<8x128xf32>
    %22 = arith.addf %19, %21 : vector<8x128xf32>
    %23 = arith.truncf %22 : vector<8x128xf32> to vector<8x128xbf16>
    %c0_17 = arith.constant 0 : index
    %c0_18 = arith.constant 0 : index
    %24 = vector.load %arg8[%c0_17, %c0_18] : memref<8x128xbf16, #tpu.memory_space<vmem>>, vector<8x128xbf16>
    tpu.vector_store %arg8[%c0_17, %c0_18], %23 {strides = array<i32>} : memref<8x128xbf16, #tpu.memory_space<vmem>>, vector<8x128xbf16>,
    return
  }
  func.func @transform_0(%arg0: i32) -> (i32, i32) {
    %c0_i32 = arith.constant 0 : i32
    %c0_i32_0 = arith.constant 0 : i32
    return %arg0, %c0_i32 : i32, i32
  }
  func.func @transform_1(%arg0: i32) -> (i32, i32) {
    %c0_i32 = arith.constant 0 : i32
    %c0_i32_0 = arith.constant 0 : i32
    %c0_i32_1 = arith.constant 0 : i32
    return %c0_i32, %c0_i32_0 : i32, i32
  }
  func.func @transform_2(%arg0: i32) -> (i32, i32) {
    %c0_i32 = arith.constant 0 : i32
    %c0_i32_0 = arith.constant 0 : i32
    %c0_i32_1 = arith.constant 0 : i32
    return %c0_i32, %c0_i32_0 : i32, i32
  }
  func.func @transform_3(%arg0: i32) -> (i32, i32) {
    %c0_i32 = arith.constant 0 : i32
    %c0_i32_0 = arith.constant 0 : i32
    %c0_i32_1 = arith.constant 0 : i32
    return %c0_i32, %c0_i32_0 : i32, i32
  }
  func.func @transform_4(%arg0: i32) -> (i32, i32) {
    %c0_i32 = arith.constant 0 : i32
    %c0_i32_0 = arith.constant 0 : i32
    %c0_i32_1 = arith.constant 0 : i32
    return %c0_i32, %c0_i32_0 : i32, i32
  }
  func.func @transform_5(%arg0: i32) -> (i32, i32) {
    %c0_i32 = arith.constant 0 : i32
    %c0_i32_0 = arith.constant 0 : i32
    %c0_i32_1 = arith.constant 0 : i32
    return %c0_i32, %c0_i32_0 : i32, i32
  }
  func.func @transform_6(%arg0: i32) -> (i32, i32) {
    %c0_i32 = arith.constant 0 : i32
    %c0_i32_0 = arith.constant 0 : i32
    %c0_i32_1 = arith.constant 0 : i32
    return %c0_i32, %c0_i32_0 : i32, i32
  }
  func.func @transform_7(%arg0: i32) -> (i32, i32) {
    %c0_i32 = arith.constant 0 : i32
    %c0_i32_0 = arith.constant 0 : i32
    return %arg0, %c0_i32 : i32, i32
  }
}

</mosaic_0001>

<bundles_post_ra>
// kernel: feedforward_nn.1
= control target key start
LH: loop header
LB: loop body
LE: loop exit
PB: predicated region body
PF: predicated region fallthrough
CT: control target
= control target key end

     0   :  { %12 = vsyncpa [#allocation3], 0  ;;  %s2119_s0 = inlined_call_operand.vmem [shape: f32[8,784], index: 0, kind: input, shape index: {}]   ;;  %s2120_s1 = inlined_call_operand.vmem [shape: bf16[784,256], index: 1, kind: input, shape index: {}]   ;;  %s2121_s2 = inlined_call_operand.vmem [shape: f32[1,256], index: 2, kind: input, shape index: {}]   ;;  %s2122_s3 = inlined_call_operand.hbm [shape: bf16[256,256], index: 3, kind: input, shape index: {}]   ;;  %s2123_s4 = inlined_call_operand.vmem [shape: f32[1,256], index: 4, kind: input, shape index: {}]   ;;  %s2124_s5 = inlined_call_operand.hbm [shape: bf16[256,128], index: 5, kind: input, shape index: {}]   ;;  %s2125_s6 = inlined_call_operand.vmem [shape: f32[1,128], index: 6, kind: input, shape index: {}]   ;;  %s2126_s7 = inlined_call_operand.vmem [shape: bf16[8,128], index: 7, kind: output, shape index: {}]  }
   0x1   :  { %13 = vsyncpa [#allocation5], 0  ;;  %s1721_s24 = smov [#allocation2]   ;;  %s1673_s28 = scalar_lea.hbm %s2122_s3, 4096 }
   0x2   :  { %s25_s25 = sshll.u32 %s1721_s24, 4  ;;  %p1674_p0 = scmp.ne.s32.totalorder %s2122_s3, %s1673_s28  ;;  %s26_s25 = int_to_ptr.vmem [resolvable:$true] %s25_s25 }
   0x3   :  { %p1677_p1 = scmp.lt.u32.totalorder %s1673_s28, %s2122_s3 }
   0x5   :  { %p1679_p2 = pnand %p1677_p1, %p1674_p0 }
   0x7   :  { %1682 = shalt.err (!%p1679_p2)
}
   0x8   :  { %s1683_s10 = scalar_lea.vmem %s26_s25, 4096  ;;  %p1688_p4 = scmp.lt.s32.totalorder %s26_s25, %s26_s25 }
   0x9   :  { %p1684_p3 = scmp.ne.s32.totalorder %s26_s25, %s1683_s10  ;;  %p1689_p5 = scmp.lt.s32.totalorder %s1683_s10, %s1683_s10 }
   0xb   :  { %p1690_p6 = por %p1689_p5, %p1688_p4 }
   0xd   :  { %p1691_p7 = pnand %p1690_p6, %p1684_p3 }
   0xf   :  { %1694 = shalt.err (!%p1691_p7)
}
  0x10   :  { %s1722_s11 = smov 128   ;;  %s1723_s12 = smov 8  }
  0x11   :  { %31 = dma.hbm_to_vmem [thread:$0]  %s2122_s3, 4096, %s26_s25, [#allocation3], %s1722_s11, %s1722_s11, %s1723_s12  }
  0x12   :  { %s1724_s15 = smov [#allocation4]   ;;  %s1695_s19 = scalar_lea.hbm %s2124_s5, 2048 }
  0x13   :  { %s39_s16 = sshll.u32 %s1724_s15, 4  ;;  %p1696_p8 = scmp.ne.s32.totalorder %s2124_s5, %s1695_s19  ;;  %s40_s16 = int_to_ptr.vmem [resolvable:$true] %s39_s16 }
  0x14   :  { %p1699_p9 = scmp.lt.u32.totalorder %s1695_s19, %s2124_s5 }
  0x16   :  { %p1701_p10 = pnand %p1699_p9, %p1696_p8 }
  0x18   :  { %1704 = shalt.err (!%p1701_p10)
}
  0x19   :  { %s1705_s24 = scalar_lea.vmem %s40_s16, 2048  ;;  %p1710_p12 = scmp.lt.s32.totalorder %s40_s16, %s40_s16 }
  0x1a   :  { %p1706_p11 = scmp.ne.s32.totalorder %s40_s16, %s1705_s24  ;;  %p1711_p13 = scmp.lt.s32.totalorder %s1705_s24, %s1705_s24 }
  0x1c   :  { %p1712_p0 = por %p1711_p13, %p1710_p12 }
  0x1e   :  { %p1713_p1 = pnand %p1712_p0, %p1706_p11 }
  0x20   :  { %1716 = shalt.err (!%p1713_p1)
}
  0x21   :  { %s1725_s3 = smov 64   ;;  %s1726_s25 = smov 4  }
  0x22   :  { %45 = dma.hbm_to_vmem [thread:$0]  %s2124_s5, 2048, %s40_s16, [#allocation5], %s1725_s3, %s1725_s3, %s1726_s25  }
  0x23   :  { %1717 = dma.done.wait [#allocation3], 4096  }
  0x24   :  { %1718 = vsyncadd [#allocation3], 4294963200 }
  0x25   :  { %1719 = dma.done.wait [#allocation5], 2048  }
  0x26   :  { %1720 = vsyncadd [#allocation5], 4294965248  ;;  %v1462_v0 = vld [vmem:[%s2120_s1 + $0x104] ss:$8 sps:$4 sm:$0xff]   ;;  %v1464_v1 = vld [vmem:[%s2120_s1 + $0x100] ss:$8 sps:$4 sm:$0xff]  }
  0x27   :  { %714 = vmatprep.subr.bf16.mxu0 %v1462_v0  ;;  %v1465_v2 = vld [vmem:[%s2120_s1 + $0x114] ss:$8 sps:$4 sm:$0xff]   ;;  %v1467_v3 = vld [vmem:[%s2120_s1 + $0x110] ss:$8 sps:$4 sm:$0xff]   ;;  %v1468_v4 = vld [vmem:[%s2120_s1 + $0x124] ss:$8 sps:$4 sm:$0xff]  }
  0x28   :  { %715 = vmatpush1.bf16.msra.mxu0 %v1464_v1  ;;  %v1470_v5 = vld [vmem:[%s2120_s1 + $0x120] ss:$8 sps:$4 sm:$0xff]   ;;  %v1471_v6 = vld [vmem:[%s2120_s1 + $0x134] ss:$8 sps:$4 sm:$0xff]   ;;  %v1473_v7 = vld [vmem:[%s2120_s1 + $0x130] ss:$8 sps:$4 sm:$0xff]  }
  0x29   :  { %716 = vmatprep.subr.bf16.mxu0 %v1465_v2  ;;  %v1474_v8 = vld [vmem:[%s2120_s1 + $0x144] ss:$8 sps:$4 sm:$0xff]   ;;  %v1476_v9 = vld [vmem:[%s2120_s1 + $0x140] ss:$8 sps:$4 sm:$0xff]   ;;  %v1477_v10 = vld [vmem:[%s2120_s1 + $0x154] ss:$8 sps:$4 sm:$0xff]  }
  0x2a   :  { %v1479_v11 = vld [vmem:[%s2120_s1 + $0x150] ss:$8 sps:$4 sm:$0xff]   ;;  %v1480_v12 = vld [vmem:[%s2120_s1 + $0x164] ss:$8 sps:$4 sm:$0xff]   ;;  %v1482_v15 = vld [vmem:[%s2120_s1 + $0x160] ss:$8 sps:$4 sm:$0xff]  }
  0x2b   :  { %v58_v13 = vld [vmem:[%s2119_s0 + $0x18] sm:$0xff]  ;;  %v1516_v17 = vld [vmem:[%s2120_s1 + $0x4] ss:$8 sps:$4 sm:$0xff]   ;;  %v1521_v20 = vld [vmem:[%s2120_s1] ss:$8 sps:$4 sm:$0xff]   ;;  %vm669_vm0 = vcmask 130048  }
  0x2c   :  { %717 = vmatpush1.bf16.msra.mxu0 %v1467_v3  ;;  %v65_v14 = vpack.c.bf16 %v58_v13, %v58_v13  ;;  %v1483_v16 = vld [vmem:[%s2120_s1 + $0x174] ss:$8 sps:$4 sm:$0xff]   ;;  %v1485_v18 = vld [vmem:[%s2120_s1 + $0x170] ss:$8 sps:$4 sm:$0xff]   ;;  %v1486_v19 = vld [vmem:[%s2120_s1 + $0x184] ss:$8 sps:$4 sm:$0xff]   ;;  %673 = vmatprep.subr.bf16.mxu1 %v1516_v17 }
  0x2d   :  { %718 = vmatprep.subr.bf16.mxu0 %v1468_v4  ;;  %v1522_v21 = vld [vmem:[%s2120_s1 + $0x14] ss:$8 sps:$4 sm:$0xff]   ;;  %674 = vmatpush1.bf16.msra.mxu1 %v1521_v20  ;;  %v1527_v22 = vld [vmem:[%s2120_s1 + $0x10] ss:$8 sps:$4 sm:$0xff]   ;;  %v1528_v23 = vld [vmem:[%s2120_s1 + $0x24] ss:$8 sps:$4 sm:$0xff]  }
  0x2e   :  { %746 = vmatprep.mubr.bf16.mxu0 %v65_v14  ;;  %675 = vmatprep.subr.bf16.mxu1 %v1522_v21  ;;  %v1488_v24 = vld [vmem:[%s2120_s1 + $0x180] ss:$8 sps:$4 sm:$0xff]   ;;  %v1489_v25 = vld [vmem:[%s2120_s1 + $0x194] ss:$8 sps:$4 sm:$0xff]   ;;  %v1491_v28 = vld [vmem:[%s2120_s1 + $0x190] ss:$8 sps:$4 sm:$0xff]  }
  0x2f   :  { %v1533_v26 = vld [vmem:[%s2120_s1 + $0x20] ss:$8 sps:$4 sm:$0xff]   ;;  %v1534_v27 = vld [vmem:[%s2120_s1 + $0x34] ss:$8 sps:$4 sm:$0xff]   ;;  %v1492_v29 = vld [vmem:[%s2120_s1 + $0x1a4] ss:$8 sps:$4 sm:$0xff]  }
  0x30   :  { %719 = vmatpush1.bf16.msra.mxu0 %v1470_v5  ;;  %v1539_v30 = vld [vmem:[%s2120_s1 + $0x30] ss:$8 sps:$4 sm:$0xff]   ;;  %v1540_v31 = vld [vmem:[%s2120_s1 + $0x44] ss:$8 sps:$4 sm:$0xff]   ;;  %v1494_v32 = vld [vmem:[%s2120_s1 + $0x1a0] ss:$8 sps:$4 sm:$0xff]  }
  0x31   :  { %720 = vmatprep.subr.bf16.mxu0 %v1471_v6  ;;  %676 = vmatpush1.bf16.msra.mxu1 %v1527_v22  ;;  %v1495_v33 = vld [vmem:[%s2120_s1 + $0x1b4] ss:$8 sps:$4 sm:$0xff]   ;;  %v1545_v34 = vld [vmem:[%s2120_s1 + $0x40] ss:$8 sps:$4 sm:$0xff]   ;;  %v1497_v36 = vld [vmem:[%s2120_s1 + $0x1b0] ss:$8 sps:$4 sm:$0xff]  }
  0x32   :  { %677 = vmatprep.subr.bf16.mxu1 %v1528_v23  ;;  %v1546_v35 = vld [vmem:[%s2120_s1 + $0x54] ss:$8 sps:$4 sm:$0xff]   ;;  %v1498_v37 = vld [vmem:[%s2120_s1 + $0x1c4] ss:$8 sps:$4 sm:$0xff]   ;;  %v1551_v38 = vld [vmem:[%s2120_s1 + $0x50] ss:$8 sps:$4 sm:$0xff]  }
  0x33   :  { %v1552_v39 = vld [vmem:[%s2120_s1 + $0x64] ss:$8 sps:$4 sm:$0xff]   ;;  %v1500_v40 = vld [vmem:[%s2120_s1 + $0x1c0] ss:$8 sps:$4 sm:$0xff]   ;;  %v1501_v41 = vld [vmem:[%s2120_s1 + $0x1d4] ss:$8 sps:$4 sm:$0xff]  }
  0x34   :  { %721 = vmatpush1.bf16.msra.mxu0 %v1473_v7  ;;  %v1557_v42 = vld [vmem:[%s2120_s1 + $0x60] ss:$8 sps:$4 sm:$0xff]   ;;  %v1558_v43 = vld [vmem:[%s2120_s1 + $0x74] ss:$8 sps:$4 sm:$0xff]   ;;  %v1503_v44 = vld [vmem:[%s2120_s1 + $0x1d0] ss:$8 sps:$4 sm:$0xff]  }
  0x35   :  { %722 = vmatprep.subr.bf16.mxu0 %v1474_v8  ;;  %678 = vmatpush1.bf16.msra.mxu1 %v1533_v26  ;;  %v1504_v45 = vld [vmem:[%s2120_s1 + $0x1e4] ss:$8 sps:$4 sm:$0xff]   ;;  %v1563_v46 = vld [vmem:[%s2120_s1 + $0x70] ss:$8 sps:$4 sm:$0xff]   ;;  %v1506_v48 = vld [vmem:[%s2120_s1 + $0x1e0] ss:$8 sps:$4 sm:$0xff]  }
  0x36   :  { %679 = vmatprep.subr.bf16.mxu1 %v1534_v27  ;;  %v1564_v47 = vld [vmem:[%s2120_s1 + $0x84] ss:$8 sps:$4 sm:$0xff]   ;;  %v1507_v49 = vld [vmem:[%s2120_s1 + $0x1f4] ss:$8 sps:$4 sm:$0xff]   ;;  %v1569_v50 = vld [vmem:[%s2120_s1 + $0x80] ss:$8 sps:$4 sm:$0xff]  }
  0x37   :  { %v1509_v51 = vld [vmem:[%s2120_s1 + $0x1f0] ss:$8 sps:$4 sm:$0xff]   ;;  %v1570_v52 = vld [vmem:[%s2120_s1 + $0x94] ss:$8 sps:$4 sm:$0xff]   ;;  %v1512_v54 = vld [vmem:[%s2120_s1 + $0x204] ss:$8 sps:$4 sm:$0xff]  }
  0x38   :  { %723 = vmatpush1.bf16.msra.mxu0 %v1476_v9  ;;  %v57_v53 = vld [vmem:[%s2119_s0 + $0x10] sm:$0xff]  ;;  %v1576_v56 = vld [vmem:[%s2120_s1 + $0xa4] ss:$8 sps:$4 sm:$0xff]   ;;  %v1510_v59 = vld [vmem:[%s2120_s1 + $0x200] ss:$8 sps:$4 sm:$0xff]  }
  0x39   :  { %724 = vmatprep.subr.bf16.mxu0 %v1477_v10  ;;  %680 = vmatpush1.bf16.msra.mxu1 %v1539_v30  ;;  %v1575_v55 = vld [vmem:[%s2120_s1 + $0x90] ss:$8 sps:$4 sm:$0xff]   ;;  %v64_v57 = vpack.c.bf16 %v57_v53, %v57_v53  ;;  %v60_v58 = vld [vmem:[%s2119_s0 + $0x28] sm:$0xff]  ;;  %v1515_v61 = vld [vmem:[%s2120_s1 + $0x214] ss:$8 sps:$4 sm:$0xff]  }
  0x3a   :  { %681 = vmatprep.subr.bf16.mxu1 %v1540_v31  ;;  %v67_v60 = vpack.c.bf16 %v60_v58, %v60_v58  ;;  %v1581_v62 = vld [vmem:[%s2120_s1 + $0xa0] ss:$8 sps:$4 sm:$0xff]   ;;  %v1582_v63 = vld [vmem:[%s2120_s1 + $0xb4] ss:$8 sps:$4 sm:$0xff]   ;;  %v1513_v1 = vld [vmem:[%s2120_s1 + $0x210] ss:$8 sps:$4 sm:$0xff]  }
  0x3b   :  { %v56_v0 = vld [vmem:[%s2119_s0 + $0x8] sm:$0xff]  ;;  %v1587_v4 = vld [vmem:[%s2120_s1 + $0xb0] ss:$8 sps:$4 sm:$0xff]   ;;  %v1526_v7 = vld [vmem:[%s2120_s1 + $0x234] ss:$8 sps:$4 sm:$0xff]  }
  0x3c   :  { %725 = vmatpush1.bf16.msra.mxu0 %v1479_v11  ;;  %v63_v2 = vpack.c.bf16 %v56_v0, %v56_v0  ;;  %v1520_v3 = vld [vmem:[%s2120_s1 + $0x224] ss:$8 sps:$4 sm:$0xff]   ;;  %v1518_v6 = vld [vmem:[%s2120_s1 + $0x220] ss:$8 sps:$4 sm:$0xff]   ;;  %v1594_v9 = vld [vmem:[%s2120_s1 + $0xd4] ss:$8 sps:$4 sm:$0xff]  }
  0x3d   :  { %726 = vmatprep.subr.bf16.mxu0 %v1480_v12  ;;  %682 = vmatpush1.bf16.msra.mxu1 %v1545_v34  ;;  %v1588_v5 = vld [vmem:[%s2120_s1 + $0xc4] ss:$8 sps:$4 sm:$0xff]   ;;  %v1593_v8 = vld [vmem:[%s2120_s1 + $0xc0] ss:$8 sps:$4 sm:$0xff]   ;;  %v1524_v10 = vld [vmem:[%s2120_s1 + $0x230] ss:$8 sps:$4 sm:$0xff]  }
  0x3e   :  { %683 = vmatprep.subr.bf16.mxu1 %v1546_v35  ;;  %705 = vmatprep.mubr.bf16.mxu1 %v63_v2  ;;  %v1532_v11 = vld [vmem:[%s2120_s1 + $0x244] ss:$8 sps:$4 sm:$0xff]   ;;  %v1599_v12 = vld [vmem:[%s2120_s1 + $0xd0] ss:$8 sps:$4 sm:$0xff]   ;;  %v1530_v14 = vld [vmem:[%s2120_s1 + $0x240] ss:$8 sps:$4 sm:$0xff]  }
  0x3f   :  { %v1600_v13 = vld [vmem:[%s2120_s1 + $0xe4] ss:$8 sps:$4 sm:$0xff]   ;;  %v1606_v17 = vld [vmem:[%s2120_s1 + $0xf4] ss:$8 sps:$4 sm:$0xff]   ;;  %v1608_v20 = vld [vmem:[%s2120_s1 + $0xf0] ss:$8 sps:$4 sm:$0xff]  }
  0x40   :  { %727 = vmatpush1.bf16.msra.mxu0 %v1482_v15  ;;  %v1538_v15 = vld [vmem:[%s2120_s1 + $0x254] ss:$8 sps:$4 sm:$0xff]   ;;  %v55_v21 = vld [vmem:[%s2119_s0] sm:$0xff]  ;;  %v1615_v34 = vld [vmem:[#allocation2 + $0x20] ss:$8 sps:$4 sm:$0xff]  }
  0x41   :  { %728 = vmatprep.subr.bf16.mxu0 %v1483_v16  ;;  %684 = vmatpush1.bf16.msra.mxu1 %v1551_v38  ;;  %v1605_v16 = vld [vmem:[%s2120_s1 + $0xe0] ss:$8 sps:$4 sm:$0xff]   ;;  %v1611_v23 = vld [vmem:[#allocation2 + $0x4] ss:$8 sps:$4 sm:$0xff]   ;;  %v62_v26 = vpack.c.bf16 %v55_v21, %v55_v21  ;;  %v1614_v27 = vld [vmem:[#allocation2 + $0x14] ss:$8 sps:$4 sm:$0xff]  }
  0x42   :  { %685 = vmatprep.subr.bf16.mxu1 %v1552_v39  ;;  %v1542_v22 = vld [vmem:[%s2120_s1 + $0x260] ss:$8 sps:$4 sm:$0xff]   ;;  %v1617_v31 = vld [vmem:[#allocation2 + $0x24] ss:$8 sps:$4 sm:$0xff]   ;;  %v1620_v35 = vld [vmem:[#allocation2 + $0x34] ss:$8 sps:$4 sm:$0xff]  }
  0x43   :  { %v1612_v30 = vld [vmem:[#allocation2 + $0x10] ss:$8 sps:$4 sm:$0xff]   ;;  %v1623_v39 = vld [vmem:[#allocation2 + $0x44] ss:$8 sps:$4 sm:$0xff]   ;;  %v1592_v53 = vld [vmem:[%s2120_s1 + $0x2e4] ss:$8 sps:$4 sm:$0xff]  }
  0x44   :  { %729 = vmatpush1.bf16.msra.mxu0 %v1485_v18  ;;  %v1536_v18 = vld [vmem:[%s2120_s1 + $0x250] ss:$8 sps:$4 sm:$0xff]   ;;  %v1618_v38 = vld [vmem:[#allocation2 + $0x30] ss:$8 sps:$4 sm:$0xff]  }
  0x45   :  { %730 = vmatprep.subr.bf16.mxu0 %v1486_v19  ;;  %686 = vmatpush1.bf16.msra.mxu1 %v1557_v42  ;;  %v1544_v19 = vld [vmem:[%s2120_s1 + $0x264] ss:$8 sps:$4 sm:$0xff]   ;;  %v1621_v42 = vld [vmem:[#allocation2 + $0x40] ss:$8 sps:$4 sm:$0xff]   ;;  %v1602_v2 = vld [vmem:[%s2120_s1 + $0x300] ss:$8 sps:$4 sm:$0xff]  }
  0x46   :  { %687 = vmatprep.subr.bf16.mxu1 %v1558_v43  ;;  %v1626_v43 = vld [vmem:[#allocation2 + $0x54] ss:$8 sps:$4 sm:$0xff]   ;;  %v1633_v58 = vld [vmem:[#allocation2 + $0x80] ss:$8 sps:$4 sm:$0xff]  }
  0x48   :  { %731 = vmatpush1.bf16.msra.mxu0 %v1488_v24  ;;  %v1550_v24 = vld [vmem:[%s2120_s1 + $0x274] ss:$8 sps:$4 sm:$0xff]  }
  0x49   :  { %732 = vmatprep.subr.bf16.mxu0 %v1489_v25  ;;  %688 = vmatpush1.bf16.msra.mxu1 %v1563_v46  ;;  %v1609_v25 = vld [vmem:[#allocation2] ss:$8 sps:$4 sm:$0xff]   ;;  %v1624_v46 = vld [vmem:[#allocation2 + $0x50] ss:$8 sps:$4 sm:$0xff]  }
  0x4a   :  { %689 = vmatprep.subr.bf16.mxu1 %v1564_v47  ;;  %v1629_v47 = vld [vmem:[#allocation2 + $0x64] ss:$8 sps:$4 sm:$0xff]  }
  0x4c   :  { %733 = vmatpush1.bf16.msra.mxu0 %v1491_v28  ;;  %v1548_v28 = vld [vmem:[%s2120_s1 + $0x270] ss:$8 sps:$4 sm:$0xff]  }
  0x4d   :  { %734 = vmatprep.subr.bf16.mxu0 %v1492_v29  ;;  %690 = vmatpush1.bf16.msra.mxu1 %v1569_v50  ;;  %v1556_v29 = vld [vmem:[%s2120_s1 + $0x284] ss:$8 sps:$4 sm:$0xff]   ;;  %v1627_v50 = vld [vmem:[#allocation2 + $0x60] ss:$8 sps:$4 sm:$0xff]  }
  0x4e   :  { %691 = vmatprep.subr.bf16.mxu1 %v1570_v52  ;;  %v1584_v52 = vld [vmem:[%s2120_s1 + $0x2d0] ss:$8 sps:$4 sm:$0xff]  }
  0x50   :  { %735 = vmatpush1.bf16.msra.mxu0 %v1494_v32  ;;  %v1554_v32 = vld [vmem:[%s2120_s1 + $0x280] ss:$8 sps:$4 sm:$0xff]  }
  0x51   :  { %736 = vmatprep.subr.bf16.mxu0 %v1495_v33  ;;  %692 = vmatpush1.bf16.msra.mxu1 %v1575_v55  ;;  %v1562_v33 = vld [vmem:[%s2120_s1 + $0x294] ss:$8 sps:$4 sm:$0xff]  }
  0x52   :  { %693 = vmatprep.subr.bf16.mxu1 %v1576_v56  ;;  %v1635_v55 = vld [vmem:[#allocation2 + $0x84] ss:$8 sps:$4 sm:$0xff]   ;;  %v1590_v56 = vld [vmem:[%s2120_s1 + $0x2e0] ss:$8 sps:$4 sm:$0xff]  }
  0x54   :  { %737 = vmatpush1.bf16.msra.mxu0 %v1497_v36  ;;  %v1560_v36 = vld [vmem:[%s2120_s1 + $0x290] ss:$8 sps:$4 sm:$0xff]  }
  0x55   :  { %738 = vmatprep.subr.bf16.mxu0 %v1498_v37  ;;  %694 = vmatpush1.bf16.msra.mxu1 %v1581_v62  ;;  %v1568_v37 = vld [vmem:[%s2120_s1 + $0x2a4] ss:$8 sps:$4 sm:$0xff]  }
  0x56   :  { %695 = vmatprep.subr.bf16.mxu1 %v1582_v63  ;;  %v1604_v62 = vld [vmem:[%s2120_s1 + $0x304] ss:$8 sps:$4 sm:$0xff]   ;;  %v1636_v63 = vld [vmem:[#allocation2 + $0x90] ss:$8 sps:$4 sm:$0xff]  }
  0x58   :  { %739 = vmatpush1.bf16.msra.mxu0 %v1500_v40  ;;  %v1566_v40 = vld [vmem:[%s2120_s1 + $0x2a0] ss:$8 sps:$4 sm:$0xff]  }
  0x59   :  { %740 = vmatprep.subr.bf16.mxu0 %v1501_v41  ;;  %696 = vmatpush1.bf16.msra.mxu1 %v1587_v4  ;;  %v1574_v41 = vld [vmem:[%s2120_s1 + $0x2b4] ss:$8 sps:$4 sm:$0xff]   ;;  %v1644_v4 = vld [vmem:[#allocation2 + $0xb4] ss:$8 sps:$4 sm:$0xff]  }
  0x5a   :  { %697 = vmatprep.subr.bf16.mxu1 %v1588_v5  ;;  %v1727_v5 = vmov 0  }
  0x5c   :  { %741 = vmatpush1.bf16.msra.mxu0 %v1503_v44  ;;  %v1572_v44 = vld [vmem:[%s2120_s1 + $0x2b0] ss:$8 sps:$4 sm:$0xff]  }
  0x5d   :  { %742 = vmatprep.subr.bf16.mxu0 %v1504_v45  ;;  %698 = vmatpush1.bf16.msra.mxu1 %v1593_v8  ;;  %v1580_v45 = vld [vmem:[%s2120_s1 + $0x2c4] ss:$8 sps:$4 sm:$0xff]   ;;  %v61_v8 = vld [vmem:[%s2119_s0 + $0x30] sm:$0xff] }
  0x5e   :  { %699 = vmatprep.subr.bf16.mxu1 %v1594_v9  ;;  %v1645_v9 = vld [vmem:[#allocation2 + $0xc0] ss:$8 sps:$4 sm:$0xff]  }
  0x60   :  { %743 = vmatpush1.bf16.msra.mxu0 %v1506_v48  ;;  %v1578_v48 = vld [vmem:[%s2120_s1 + $0x2c0] ss:$8 sps:$4 sm:$0xff]  }
  0x61   :  { %744 = vmatprep.subr.bf16.mxu0 %v1507_v49  ;;  %700 = vmatpush1.bf16.msra.mxu1 %v1599_v12  ;;  %v1586_v49 = vld [vmem:[%s2120_s1 + $0x2d4] ss:$8 sps:$4 sm:$0xff]   ;;  %v1650_v12 = vld [vmem:[#allocation2 + $0xd4] ss:$8 sps:$4 sm:$0xff]  }
  0x62   :  { %701 = vmatprep.subr.bf16.mxu1 %v1600_v13  ;;  %v1653_v13 = vld [vmem:[#allocation2 + $0xe4] ss:$8 sps:$4 sm:$0xff]  }
  0x64   :  { %745 = vmatpush1.bf16.msra.mxu0 %v1509_v51  ;;  %v1632_v51 = vld [vmem:[#allocation2 + $0x74] ss:$8 sps:$4 sm:$0xff]  }
  0x65   :  { %755 = vmatprep.subr.bf16.mxu0 %v1512_v54  ;;  %702 = vmatpush1.bf16.msra.mxu1 %v1605_v16  ;;  %v1630_v54 = vld [vmem:[#allocation2 + $0x70] ss:$8 sps:$4 sm:$0xff]  }
  0x66   :  { %703 = vmatprep.subr.bf16.mxu1 %v1606_v17  ;;  %v1654_v16 = vld [vmem:[#allocation2 + $0xf0] ss:$8 sps:$4 sm:$0xff]   ;;  %v1657_v17 = vld [vmem:[#allocation4 + $0x40] sm:$0xff]  }
  0x67   :  { %747 = vmatmul.mubr.bf16.vlgmr.msra.gmra.mrb[0].mxu0 %v64_v57  ;;  %v1598_v57 = vld [vmem:[%s2120_s1 + $0x2f4] ss:$8 sps:$4 sm:$0xff]  }
  0x68   :  { %756 = vmatpush1.bf16.msra.mxu0 %v1510_v59  ;;  %787 = vmatprep.mubr.bf16.mxu0 %v67_v60  ;;  %v1638_v59 = vld [vmem:[#allocation2 + $0x94] ss:$8 sps:$4 sm:$0xff]   ;;  %v1596_v60 = vld [vmem:[%s2120_s1 + $0x2f0] ss:$8 sps:$4 sm:$0xff]  }
  0x69   :  { %757 = vmatprep.subr.bf16.mxu0 %v1515_v61  ;;  %704 = vmatpush1.bf16.msra.mxu1 %v1608_v20  ;;  %v59_v61 = vld [vmem:[%s2119_s0 + $0x20] sm:$0xff] }
  0x6a   :  { %1045 = vmatprep.subr.bf16.mxu1 %v1611_v23  ;;  %v66_v0 = vpack.c.bf16 %v59_v61, %v59_v61 }
  0x6c   :  { %758 = vmatpush1.bf16.msra.mxu0 %v1513_v1  ;;  %706 = vmatmul.mubr.bf16.vlgmr.msra.gmra.mrb[0].mxu1 %v62_v26  ;;  %v1641_v1 = vld [vmem:[#allocation2 + $0xa4] ss:$8 sps:$4 sm:$0xff]  }
  0x6d   :  { %759 = vmatprep.subr.bf16.mxu0 %v1520_v3  ;;  %1046 = vmatpush1.bf16.msra.mxu1 %v1609_v25  ;;  %v1639_v3 = vld [vmem:[#allocation2 + $0xa0] ss:$8 sps:$4 sm:$0xff]   ;;  %v167_v25 = vld [vmem:[%s2121_s2] sm:$0x3] }
  0x6e   :  { %1047 = vmatprep.subr.bf16.mxu1 %v1614_v27 }
  0x70   :  { %760 = vmatpush1.bf16.msra.mxu0 %v1518_v6  ;;  %v1642_v6 = vld [vmem:[#allocation2 + $0xb0] ss:$8 sps:$4 sm:$0xff]  }
  0x71   :  { %761 = vmatprep.subr.bf16.mxu0 %v1526_v7  ;;  %1048 = vmatpush1.bf16.msra.mxu1 %v1612_v30  ;;  %v1647_v7 = vld [vmem:[#allocation2 + $0xc4] ss:$8 sps:$4 sm:$0xff]  }
  0x72   :  { %1049 = vmatprep.subr.bf16.mxu1 %v1617_v31 }
  0x74   :  { %762 = vmatpush1.bf16.msra.mxu0 %v1524_v10  ;;  %v68_v10 = vpack.c.bf16 %v61_v8, %v61_v8 }
  0x75   :  { %763 = vmatprep.subr.bf16.mxu0 %v1532_v11  ;;  %1050 = vmatpush1.bf16.msra.mxu1 %v1615_v34  ;;  %v1648_v11 = vld [vmem:[#allocation2 + $0xd0] ss:$8 sps:$4 sm:$0xff]  }
  0x76   :  { %1051 = vmatprep.subr.bf16.mxu1 %v1620_v35 }
  0x78   :  { %764 = vmatpush1.bf16.msra.mxu0 %v1530_v14  ;;  %v1651_v14 = vld [vmem:[#allocation2 + $0xe0] ss:$8 sps:$4 sm:$0xff]  }
  0x79   :  { %765 = vmatprep.subr.bf16.mxu0 %v1538_v15  ;;  %1052 = vmatpush1.bf16.msra.mxu1 %v1618_v38  ;;  %v1656_v15 = vld [vmem:[#allocation2 + $0xf4] ss:$8 sps:$4 sm:$0xff]  }
  0x7a   :  { %1053 = vmatprep.subr.bf16.mxu1 %v1623_v39 }
  0x7c   :  { %766 = vmatpush1.bf16.msra.mxu0 %v1536_v18 }
  0x7d   :  { %767 = vmatprep.subr.bf16.mxu0 %v1544_v19  ;;  %1054 = vmatpush1.bf16.msra.mxu1 %v1621_v42  ;;  %v1659_v42 = vld [vmem:[#allocation4 + $0x48] sm:$0xff]  }
  0x7e   :  { %1055 = vmatprep.subr.bf16.mxu1 %v1626_v43  ;;  %v1660_v43 = vld [vmem:[#allocation4 + $0x8] sm:$0xff]  }
  0x80   :  { %768 = vmatpush1.bf16.msra.mxu0 %v1542_v22  ;;  %v169_v22 = vlaneseq }
  0x81   :  { %769 = vmatprep.subr.bf16.mxu0 %v1550_v24  ;;  %1056 = vmatpush1.bf16.msra.mxu1 %v1624_v46  ;;  %v1663_v46 = vld [vmem:[#allocation4 + $0x58] sm:$0xff]  }
  0x82   :  { %1057 = vmatprep.subr.bf16.mxu1 %v1629_v47  ;;  %v170_v23 = vshrl.u32 %v169_v22, 7  ;;  %v1664_v47 = vld [vmem:[#allocation4 + $0x18] sm:$0xff]  }
  0x84   :  { %770 = vmatpush1.bf16.msra.mxu0 %v1548_v28  ;;  %v171_v24 = vsub.s32 0, %v170_v23  ;;  %v175_v26 = vsub.s32 1, %v170_v23 }
  0x85   :  { %771 = vmatprep.subr.bf16.mxu0 %v1556_v29  ;;  %1058 = vmatpush1.bf16.msra.mxu1 %v1627_v50  ;;  %v1667_v50 = vld [vmem:[#allocation4 + $0x68] sm:$0xff]  }
  0x86   :  { %1059 = vmatprep.subr.bf16.mxu1 %v1632_v51  ;;  %v172_v27 = vrot.slane %v167_v25, %v171_v24  ;;  %v176_v28 = vrot.slane %v167_v25, %v175_v26  ;;  %v1668_v51 = vld [vmem:[#allocation4 + $0x28] sm:$0xff]  }
  0x88   :  { %772 = vmatpush1.bf16.msra.mxu0 %v1554_v32 }
  0x89   :  { %773 = vmatprep.subr.bf16.mxu0 %v1562_v33  ;;  %1060 = vmatpush1.bf16.msra.mxu1 %v1630_v54  ;;  %v1671_v54 = vld [vmem:[#allocation4 + $0x78] sm:$0xff]  }
  0x8a   :  { %1061 = vmatprep.subr.bf16.mxu1 %v1635_v55  ;;  %v1672_v55 = vld [vmem:[#allocation4 + $0x38] sm:$0xff]  }
  0x8c   :  { %774 = vmatpush1.bf16.msra.mxu0 %v1560_v36 }
  0x8d   :  { %775 = vmatprep.subr.bf16.mxu0 %v1568_v37  ;;  %1062 = vmatpush1.bf16.msra.mxu1 %v1633_v58 }
  0x8e   :  { %1063 = vmatprep.subr.bf16.mxu1 %v1638_v59 }
  0x90   :  { %776 = vmatpush1.bf16.msra.mxu0 %v1566_v40  ;;  %v1658_v40 = vld [vmem:[#allocation4] sm:$0xff]  }
  0x91   :  { %777 = vmatprep.subr.bf16.mxu0 %v1574_v41  ;;  %1064 = vmatpush1.bf16.msra.mxu1 %v1636_v63 }
  0x92   :  { %1065 = vmatprep.subr.bf16.mxu1 %v1641_v1 }
  0x94   :  { %778 = vmatpush1.bf16.msra.mxu0 %v1572_v44  ;;  %v1661_v44 = vld [vmem:[#allocation4 + $0x50] sm:$0xff]  }
  0x95   :  { %779 = vmatprep.subr.bf16.mxu0 %v1580_v45  ;;  %1066 = vmatpush1.bf16.msra.mxu1 %v1639_v3  ;;  %v1662_v45 = vld [vmem:[#allocation4 + $0x10] sm:$0xff]  }
  0x96   :  { %1067 = vmatprep.subr.bf16.mxu1 %v1644_v4 }
  0x98   :  { %780 = vmatpush1.bf16.msra.mxu0 %v1578_v48  ;;  %v1665_v48 = vld [vmem:[#allocation4 + $0x60] sm:$0xff]  }
  0x99   :  { %781 = vmatprep.subr.bf16.mxu0 %v1586_v49  ;;  %1068 = vmatpush1.bf16.msra.mxu1 %v1642_v6  ;;  %v1666_v49 = vld [vmem:[#allocation4 + $0x20] sm:$0xff]   ;;  %v1404_v6 = vld [vmem:[%s2125_s6] ss:$0 sm:$0xff] }
  0x9a   :  { %1069 = vmatprep.subr.bf16.mxu1 %v1647_v7 }
  0x9c   :  { %782 = vmatpush1.bf16.msra.mxu0 %v1584_v52  ;;  %v1669_v52 = vld [vmem:[#allocation4 + $0x70] sm:$0xff]  }
  0x9d   :  { %783 = vmatprep.subr.bf16.mxu0 %v1592_v53  ;;  %1070 = vmatpush1.bf16.msra.mxu1 %v1645_v9  ;;  %v1670_v53 = vld [vmem:[#allocation4 + $0x30] sm:$0xff]  }
  0x9e   :  { %1071 = vmatprep.subr.bf16.mxu1 %v1650_v12 }
  0xa0   :  { %784 = vmatpush1.bf16.msra.mxu0 %v1590_v56  ;;  %v873_v56 = vld [vmem:[%s2123_s4] sm:$0x3] }
  0xa1   :  { %785 = vmatprep.subr.bf16.mxu0 %v1598_v57  ;;  %1072 = vmatpush1.bf16.msra.mxu1 %v1648_v11  ;;  %v878_v57 = vrot.slane %v873_v56, %v171_v24  ;;  %v882_v58 = vrot.slane %v873_v56, %v175_v26 }
  0xa2   :  { %1073 = vmatprep.subr.bf16.mxu1 %v1653_v13 }
  0xa4   :  { %786 = vmatpush1.bf16.msra.mxu0 %v1596_v60 }
  0xa5   :  { %796 = vmatprep.subr.bf16.mxu0 %v1604_v62  ;;  %1074 = vmatpush1.bf16.msra.mxu1 %v1651_v14 }
  0xa6   :  { %1075 = vmatprep.subr.bf16.mxu1 %v1656_v15 }
  0xa7   :  { %788 = vmatmul.mubr.bf16.vlgmr.msra.gmra.mrb[0].mxu0 %v66_v0 }
  0xa8   :  { %797 = vmatpush1.bf16.msra.mxu0 %v1602_v2  ;;  %828 = vmatprep.mubr.bf16.mxu0 %v1727_v5 }
  0xa9   :  { %1076 = vmatpush1.bf16.msra.mxu1 %v1654_v16 }
  0xaa   :  { %1421 = vmatprep.subr.bf16.mxu1 %v1657_v17 }
  0xb3   :  { %1371 = vmatmul.mubr.msk.bf16.vlgmr.msra.gmra.mrb[0].mxu0 %vm669_vm0, %v68_v10 }
 0x13f   :  { %v707_v18 = vpop.f32.mrb[0].mxu1 }
 0x140   :  { %v709_v19 = vpop.f32.mrb[1].mxu1  ;;  %v708_v29 = vadd.f32 %v707_v18, %v172_v27 }
 0x141   :  { %v711_v20 = vpop.f32.mrb[2].mxu1  ;;  %v710_v30 = vadd.f32 %v709_v19, %v176_v28 }
 0x142   :  { %v712_v21 = vpop.f32.mrb[3].mxu1 }
 0x186   :  { %v830_v31 = vpop.f32.mrb[0].mxu0 }
 0x187   :  { %v1444_v32 = vadd.f32 %v830_v31, %v708_v29  ;;  %v832_v33 = vpop.f32.mrb[1].mxu0 }
 0x188   :  { %v1446_v34 = vadd.f32 %v832_v33, %v710_v30  ;;  %v834_v35 = vpop.f32.mrb[2].mxu0 }
 0x189   :  { %v837_v36 = vmax.f32 %v1444_v32, 0.0  ;;  %v835_v37 = vpop.f32.mrb[3].mxu0 }
 0x18a   :  { %v838_v38 = vmax.f32 %v1446_v34, 0.0 }
 0x18b   :  { %v839_v41 = vpack.c.bf16 %v837_v36, %v837_v36 }
 0x18c   :  { %v840_v39 = vpack.c.bf16 %v838_v38, %v838_v38 }
 0x18e   :  { %1077 = vmatprep.mubr.bf16.mxu1 %v840_v39 }
 0x18f   :  { %1078 = vmatmul.mubr.bf16.vlgmr.msra.gmra.mrb[4].mxu1 %v839_v41 }
 0x190   :  { %1422 = vmatpush3.bf16.msra.mxu1 %v1658_v40 }
 0x191   :  { %1423 = vmatprep.subr.bf16.mxu1 %v1659_v42 }
 0x194   :  { %1424 = vmatpush3.bf16.msra.mxu1 %v1660_v43 }
 0x195   :  { %1425 = vmatprep.subr.bf16.mxu1 %v1661_v44 }
 0x198   :  { %1426 = vmatpush3.bf16.msra.mxu1 %v1662_v45 }
 0x199   :  { %1427 = vmatprep.subr.bf16.mxu1 %v1663_v46 }
 0x19c   :  { %1428 = vmatpush3.bf16.msra.mxu1 %v1664_v47 }
 0x19d   :  { %1429 = vmatprep.subr.bf16.mxu1 %v1665_v48 }
 0x1a0   :  { %1430 = vmatpush3.bf16.msra.mxu1 %v1666_v49 }
 0x1a1   :  { %1431 = vmatprep.subr.bf16.mxu1 %v1667_v50 }
 0x1a4   :  { %1432 = vmatpush3.bf16.msra.mxu1 %v1668_v51 }
 0x1a5   :  { %1433 = vmatprep.subr.bf16.mxu1 %v1669_v52 }
 0x1a8   :  { %1434 = vmatpush3.bf16.msra.mxu1 %v1670_v53 }
 0x1a9   :  { %1435 = vmatprep.subr.bf16.mxu1 %v1671_v54 }
 0x1ac   :  { %1436 = vmatpush3.bf16.msra.mxu1 %v1672_v55 }
 0x262   :  { %v1079_v59 = vpop.f32.mrb[4].mxu1 }
 0x263   :  { %v1080_v60 = vadd.f32 %v1079_v59, %v878_v57  ;;  %v1081_v61 = vpop.f32.mrb[5].mxu1 }
 0x264   :  { %v1082_v62 = vadd.f32 %v1081_v61, %v882_v58  ;;  %v1083_v63 = vpop.f32.mrb[6].mxu1 }
 0x265   :  { %v1086_v0 = vmax.f32 %v1080_v60, 0.0  ;;  %v1084_v1 = vpop.f32.mrb[7].mxu1 }
 0x266   :  { %v1087_v2 = vmax.f32 %v1082_v62, 0.0 }
 0x267   :  { %v1088_v4 = vpack.c.bf16 %v1086_v0, %v1086_v0 }
 0x268   :  { %v1089_v3 = vpack.c.bf16 %v1087_v2, %v1087_v2 }
 0x26a   :  { %1257 = vmatprep.mubr.bf16.mxu1 %v1089_v3 }
 0x26b   :  { %1258 = vmatmul.mubr.bf16.vlgmr.msra.gmra.mrb[8].mxu1 %v1088_v4 }
 0x33e   :  { %v1437_v5 = vpop.f32.mrb[8].mxu1 }
 0x33f   :  { %v1438_v7 = vpop.f32.mrb[9].mxu1 }
 0x340   :  { %v1439_v8 = vadd.f32 %v1438_v7, %v1437_v5  ;;  %v1440_v9 = vpop.f32.mrb[10].mxu1 }
 0x341   :  { %v1441_v10 = vpop.f32.mrb[11].mxu1 }
 0x342   :  { %v1260_v11 = vadd.f32 %v1439_v8, %v1404_v6 }
 0x344   :  { %v1265_v12 = vpack.c.bf16 %v1260_v11, %v1260_v11 }
 0x346   :  { %1266 = vst [vmem:[%s2126_s7] sm:$0xf] %v1265_v12 }
 0x347   :  { %1271 = vsyncpa [#allocation3], 1 }
 0x348   :  { %1272 = vsyncpa [#allocation5], 1 }

</bundles_post_ra>
